<compile_context>
chip_gen: v5e
topology: v5e:2x2
jax: 0.10.0
libtpu: 0.0.40
codegen_flags: <defaults>
</compile_context>

<pallas_src>
import functools

import jax
import jax.numpy as jnp
from jax.experimental import pallas as pl
from jax.experimental.pallas import tpu as pltpu


def _actor_kernel(x_ref, w1_ref, b1_ref, w2_ref, b2_ref, o_ref, *, lane_dense):
    # Layer 1: x @ W1 + b1, ReLU.  MXU matmul, f32 accumulate.
    h = jnp.dot(x_ref[...], w1_ref[...], preferred_element_type=jnp.float32)
    h = jnp.maximum(h + b1_ref[...], 0.0)
    # Layer 2 logits (cast h to the weight dtype so bf16 weights hit the
    # bf16-native MXU path; accumulation stays f32).
    logits = jnp.dot(h.astype(w2_ref.dtype), w2_ref[...],
                     preferred_element_type=jnp.float32) + b2_ref[...]
    # Numerically-stable log_softmax over the action axis (PyTorch dim=1).
    m = jnp.max(logits, axis=-1, keepdims=True)
    shifted = logits - m
    lse = jnp.log(jnp.sum(jnp.exp(shifted), axis=-1, keepdims=True))
    out = shifted - lse                                    # (block_b, n_actions) f32
    if lane_dense:
        # Lane-dense store: (n_actions, block_b).  The transpose rides the XLU
        # slot; stores become full-width vst and the writeback DMA is contiguous.
        o_ref[...] = out.T.astype(o_ref.dtype)
    else:
        o_ref[...] = out.astype(o_ref.dtype)


_MAX_BLOCK_B = 8192  # keeps x tile + f32 temporaries well inside scoped VMEM


def _pick_block_b(B, block_b):
    if block_b is None:
        if B <= 128:
            return B                       # single (possibly ragged) block
        # >= 2 grid steps so both v7x TensorCores get work; tiles as large as
        # reasonable to amortize the ~0.35us per-step overhead on v5e/v6e.
        half = (B + 1) // 2
        block_b = min(_MAX_BLOCK_B, ((half + 127) // 128) * 128)
    else:
        block_b = int(block_b)
    if block_b >= B:
        return B
    # The batch tile becomes the lane dim of the transposed output block, so it
    # must be a multiple of 128 (or the whole batch).
    block_b = ((block_b + 127) // 128) * 128
    return B if block_b >= B else block_b


@functools.lru_cache(maxsize=None)
def _build_forward(B, n_features, hidden, n_actions, block_b, lane_dense):
    grid = (pl.cdiv(B, block_b),)
    if lane_dense:
        out_shape = jax.ShapeDtypeStruct((n_actions, B), jnp.float32)
        out_spec = pl.BlockSpec((n_actions, block_b), lambda i: (0, i))
    else:
        out_shape = jax.ShapeDtypeStruct((B, n_actions), jnp.float32)
        out_spec = pl.BlockSpec((block_b, n_actions), lambda i: (i, 0))
    call = pl.pallas_call(
        functools.partial(_actor_kernel, lane_dense=lane_dense),
        out_shape=out_shape,
        grid=grid,
        in_specs=[
            # Batch-tiled activations.
            pl.BlockSpec((block_b, n_features), lambda i: (i, 0)),
            # Weights / biases stay resident across the whole grid.
            pl.BlockSpec((n_features, hidden), lambda i: (0, 0)),
            pl.BlockSpec((1, hidden), lambda i: (0, 0)),
            pl.BlockSpec((hidden, n_actions), lambda i: (0, 0)),
            pl.BlockSpec((1, n_actions), lambda i: (0, 0)),
        ],
        out_specs=out_spec,
        compiler_params=pltpu.CompilerParams(
            dimension_semantics=("parallel",),
            vmem_limit_bytes=48 * 1024 * 1024),
    )
    return jax.jit(call)


_LANE_DENSE_OK = None


def _lane_dense_supported():
    """One-time feature probe for the transposed (lane-dense) output store.

    The (block_b, n_actions) -> (n_actions, block_b) in-kernel transpose is the
    biggest store-efficiency lever here, but it leans on Mosaic's XLU transpose
    lowering for a 4-wide minor dim; if this toolchain rejects it (or gets it
    wrong), silently fall back to the row-major output layout.
    """
    global _LANE_DENSE_OK
    if _LANE_DENSE_OK is None:
        try:
            key = jax.random.PRNGKey(1234)
            kx, kp = jax.random.split(key)
            B, F, A = 256, 32, 4
            x = jax.random.normal(kx, (B, F), jnp.float32)
            w1, b1, w2, b2 = init_actor_params(kp, F, A)
            got = actor_net_forward(x, w1, b1, w2, b2, block_b=128,
                                    activation_dtype=None, lane_dense_out=True)
            ref = jax.nn.log_softmax(
                jnp.maximum(x @ w1 + b1, 0.0) @ w2 + b2, axis=-1)
            _LANE_DENSE_OK = bool(jnp.allclose(jax.block_until_ready(got), ref,
                                               atol=1e-4, rtol=1e-4))
        except Exception:
            _LANE_DENSE_OK = False
    return _LANE_DENSE_OK


def actor_net_forward(x, w1, b1, w2, b2, *, block_b=None,
                      activation_dtype=jnp.bfloat16, lane_dense_out=None):
    """x: (B, n_features); w1: (n_features, 40); b1: (1, 40);
       w2: (40, n_actions); b2: (1, n_actions) -> (B, n_actions) f32 log-probs.

    block_b: batch-tile size (rows per grid step).  Default picks >= 2 grid
             steps (v7x megacore) with tiles up to 8192 rows.
    activation_dtype: dtype for x/W1/W2 on the MXU (default bf16, f32 accum);
             pass None to keep exact f32 (e.g. for tight parity checks).
    lane_dense_out: force/disable the transposed lane-dense output layout;
             None = auto (probe once).
    """
    B, n_features = x.shape
    hidden = w1.shape[1]
    n_actions = w2.shape[1]

    if activation_dtype is not None:
        # bf16 halves the dominant HBM stream (x).  Under jit these casts fuse
        # into the producers of x / the parameter store.
        x = x.astype(activation_dtype)
        w1 = w1.astype(activation_dtype)
        w2 = w2.astype(activation_dtype)
    b1 = b1.astype(jnp.float32)
    b2 = b2.astype(jnp.float32)

    block_b = _pick_block_b(B, block_b)
    lane_dense = (_lane_dense_supported() if lane_dense_out is None
                  else bool(lane_dense_out))

    call = _build_forward(B, n_features, hidden, n_actions, block_b, lane_dense)
    out = call(x, w1, b1, w2, b2)
    # Undo the lane-dense layout outside the kernel; the output is only
    # B * n_actions floats, negligible next to the kernel's x traffic.
    return out.T if lane_dense else out


def init_actor_params(key, n_features, n_actions, hidden=40):
    """Deterministic init mimicking nn.Linear's default U(-1/sqrt(fan_in), +)."""
    k1, k2, k3, k4 = jax.random.split(key, 4)
    bound1 = 1.0 / jnp.sqrt(jnp.float32(n_features))
    bound2 = 1.0 / jnp.sqrt(jnp.float32(hidden))
    # Stored already transposed: (in, out).
    w1 = jax.random.uniform(k1, (n_features, hidden), jnp.float32, -bound1, bound1)
    b1 = jax.random.uniform(k2, (1, hidden), jnp.float32, -bound1, bound1)
    w2 = jax.random.uniform(k3, (hidden, n_actions), jnp.float32, -bound2, bound2)
    b2 = jax.random.uniform(k4, (1, n_actions), jnp.float32, -bound2, bound2)
    return w1, b1, w2, b2


if __name__ == "__main__":
    key = jax.random.PRNGKey(0)
    k_x, k_p, k_x2 = jax.random.split(key, 3)

    # Small shapes consistent with the module: batch=8, n_features=32, n_actions=4
    B, n_features, n_actions = 8, 32, 4
    x = jax.random.normal(k_x, (B, n_features), jnp.float32)
    w1, b1, w2, b2 = init_actor_params(k_p, n_features, n_actions)

    ref = jax.nn.log_softmax(jnp.maximum(x @ w1 + b1, 0.0) @ w2 + b2, axis=-1)

    # Exact f32 path (tight tolerance).
    out_f32 = jax.block_until_ready(
        actor_net_forward(x, w1, b1, w2, b2, activation_dtype=None))
    assert out_f32.shape == (B, n_actions)
    assert jnp.allclose(out_f32, ref, atol=1e-4, rtol=1e-4)

    # Default path (bf16 activations/weights, f32 accumulation).
    out_bf16 = jax.block_until_ready(actor_net_forward(x, w1, b1, w2, b2))
    assert out_bf16.shape == (B, n_actions)
    assert jnp.allclose(out_bf16, ref, atol=5e-2)

    # Batched rollout path: grid > 1 ('parallel' batch axis), ragged last tile,
    # no wrapper-side padding of x.
    B2 = 250  # deliberately not a multiple of the tile
    x2 = jax.random.normal(k_x2, (B2, n_features), jnp.float32)
    ref2 = jax.nn.log_softmax(jnp.maximum(x2 @ w1 + b1, 0.0) @ w2 + b2, axis=-1)
    out2 = jax.block_until_ready(
        actor_net_forward(x2, w1, b1, w2, b2, block_b=128))
    assert out2.shape == (B2, n_actions)
    assert jnp.allclose(out2, ref2, atol=5e-2)

    print("KERNEL_OK")
</pallas_src>

<mosaic_0001>
module attributes {stable_mosaic.version = 11 : i64} {
  func.func @_actor_kernel(%arg0: i32, %arg1: memref<128x32xf32, #tpu.memory_space<vmem>>, %arg2: memref<32x40xf32, #tpu.memory_space<vmem>>, %arg3: memref<1x40xf32, #tpu.memory_space<vmem>>, %arg4: memref<40x4xf32, #tpu.memory_space<vmem>>, %arg5: memref<1x4xf32, #tpu.memory_space<vmem>>, %arg6: memref<4x128xf32, #tpu.memory_space<vmem>>) attributes {dimension_semantics = [#tpu.dimension_semantics<parallel>], iteration_bounds = array<i64: 2>, scalar_prefetch = 0 : i64, scratch_operands = 0 : i64, tpu.core_type = #tpu.core_type<tc>, window_params = [{transform_indices = @transform_0, window_bounds = array<i64: 128, 32>}, {pipeline_mode = #tpu.pipeline_mode<synchronous>, transform_indices = @transform_1, window_bounds = array<i64: 32, 40>}, {pipeline_mode = #tpu.pipeline_mode<synchronous>, transform_indices = @transform_2, window_bounds = array<i64: 1, 40>}, {pipeline_mode = #tpu.pipeline_mode<synchronous>, transform_indices = @transform_3, window_bounds = array<i64: 40, 4>}, {pipeline_mode = #tpu.pipeline_mode<synchronous>, transform_indices = @transform_4, window_bounds = array<i64: 1, 4>}, {transform_indices = @transform_5, window_bounds = array<i64: 4, 128>}]} {
    %c0 = arith.constant 0 : index
    %c0_0 = arith.constant 0 : index
    %0 = vector.load %arg1[%c0, %c0_0] : memref<128x32xf32, #tpu.memory_space<vmem>>, vector<128x32xf32>
    %c0_1 = arith.constant 0 : index
    %c0_2 = arith.constant 0 : index
    %1 = vector.load %arg2[%c0_1, %c0_2] : memref<32x40xf32, #tpu.memory_space<vmem>>, vector<32x40xf32>
    %cst = arith.constant dense<0.000000e+00> : vector<128x40xf32>
    %2 = tpu.matmul %0, %1, %cst {dimension_numbers = #tpu.dot_dimension_numbers<[1], [0], [0], [1], [0, 0, 1, 1], [], []>} : vector<128x32xf32>, vector<32x40xf32>, vector<128x40xf32> -> vector<128x40xf32>
    %c0_3 = arith.constant 0 : index
    %c0_4 = arith.constant 0 : index
    %3 = vector.load %arg3[%c0_3, %c0_4] : memref<1x40xf32, #tpu.memory_space<vmem>>, vector<1x40xf32>
    %4 = vector.broadcast %3 : vector<1x40xf32> to vector<128x40xf32>
    %5 = arith.addf %2, %4 : vector<128x40xf32>
    %cst_5 = arith.constant 0.000000e+00 : f32
    %6 = vector.broadcast %cst_5 : f32 to vector<128x40xf32>
    %7 = arith.maximumf %5, %6 : vector<128x40xf32>
    %c0_6 = arith.constant 0 : index
    %c0_7 = arith.constant 0 : index
    %8 = vector.load %arg4[%c0_6, %c0_7] : memref<40x4xf32, #tpu.memory_space<vmem>>, vector<40x4xf32>
    %cst_8 = arith.constant dense<0.000000e+00> : vector<128x4xf32>
    %9 = tpu.matmul %7, %8, %cst_8 {dimension_numbers = #tpu.dot_dimension_numbers<[1], [0], [0], [1], [0, 0, 1, 1], [], []>} : vector<128x40xf32>, vector<40x4xf32>, vector<128x4xf32> -> vector<128x4xf32>
    %c0_9 = arith.constant 0 : index
    %c0_10 = arith.constant 0 : index
    %10 = vector.load %arg5[%c0_9, %c0_10] : memref<1x4xf32, #tpu.memory_space<vmem>>, vector<1x4xf32>
    %11 = vector.broadcast %10 : vector<1x4xf32> to vector<128x4xf32>
    %12 = arith.addf %9, %11 : vector<128x4xf32>
    %cst_11 = arith.constant dense<0xFF800000> : vector<128xf32>
    %13 = vector.multi_reduction <maximumf>, %12, %cst_11 [1] : vector<128x4xf32> to vector<128xf32>
    %14 = vector.shape_cast %13 : vector<128xf32> to vector<128x1xf32>
    %15 = vector.broadcast %14 : vector<128x1xf32> to vector<128x4xf32>
    %16 = arith.subf %12, %15 : vector<128x4xf32>
    %17 = math.exp %16 : vector<128x4xf32>
    %cst_12 = arith.constant dense<0.000000e+00> : vector<128xf32>
    %18 = vector.multi_reduction <add>, %17, %cst_12 [1] : vector<128x4xf32> to vector<128xf32>
    %19 = vector.shape_cast %18 : vector<128xf32> to vector<128x1xf32>
    %20 = math.log %19 : vector<128x1xf32>
    %21 = vector.broadcast %20 : vector<128x1xf32> to vector<128x4xf32>
    %22 = arith.subf %16, %21 : vector<128x4xf32>
    %23 = tpu.transpose %22, [1, 0] : vector<128x4xf32> -> vector<4x128xf32>
    %c0_13 = arith.constant 0 : index
    %c0_14 = arith.constant 0 : index
    %24 = vector.load %arg6[%c0_13, %c0_14] : memref<4x128xf32, #tpu.memory_space<vmem>>, vector<4x128xf32>
    tpu.vector_store %arg6[%c0_13, %c0_14], %23 {strides = array<i32>} : memref<4x128xf32, #tpu.memory_space<vmem>>, vector<4x128xf32>,
    return
  }
  func.func @transform_0(%arg0: i32) -> (i32, i32) {
    %c0_i32 = arith.constant 0 : i32
    %c0_i32_0 = arith.constant 0 : i32
    return %arg0, %c0_i32 : i32, i32
  }
  func.func @transform_1(%arg0: i32) -> (i32, i32) {
    %c0_i32 = arith.constant 0 : i32
    %c0_i32_0 = arith.constant 0 : i32
    %c0_i32_1 = arith.constant 0 : i32
    return %c0_i32, %c0_i32_0 : i32, i32
  }
  func.func @transform_2(%arg0: i32) -> (i32, i32) {
    %c0_i32 = arith.constant 0 : i32
    %c0_i32_0 = arith.constant 0 : i32
    %c0_i32_1 = arith.constant 0 : i32
    return %c0_i32, %c0_i32_0 : i32, i32
  }
  func.func @transform_3(%arg0: i32) -> (i32, i32) {
    %c0_i32 = arith.constant 0 : i32
    %c0_i32_0 = arith.constant 0 : i32
    %c0_i32_1 = arith.constant 0 : i32
    return %c0_i32, %c0_i32_0 : i32, i32
  }
  func.func @transform_4(%arg0: i32) -> (i32, i32) {
    %c0_i32 = arith.constant 0 : i32
    %c0_i32_0 = arith.constant 0 : i32
    %c0_i32_1 = arith.constant 0 : i32
    return %c0_i32, %c0_i32_0 : i32, i32
  }
  func.func @transform_5(%arg0: i32) -> (i32, i32) {
    %c0_i32 = arith.constant 0 : i32
    %c0_i32_0 = arith.constant 0 : i32
    return %c0_i32, %arg0 : i32, i32
  }
}

module attributes {stable_mosaic.version = 11 : i64} {
  func.func @_actor_kernel(%arg0: i32, %arg1: memref<8x32xf32, #tpu.memory_space<vmem>>, %arg2: memref<32x40xf32, #tpu.memory_space<vmem>>, %arg3: memref<1x40xf32, #tpu.memory_space<vmem>>, %arg4: memref<40x4xf32, #tpu.memory_space<vmem>>, %arg5: memref<1x4xf32, #tpu.memory_space<vmem>>, %arg6: memref<8x4xf32, #tpu.memory_space<vmem>>) attributes {dimension_semantics = [#tpu.dimension_semantics<parallel>], iteration_bounds = array<i64: 1>, scalar_prefetch = 0 : i64, scratch_operands = 0 : i64, tpu.core_type = #tpu.core_type<tc>, window_params = [{transform_indices = @transform_0, window_bounds = array<i64: 8, 32>}, {pipeline_mode = #tpu.pipeline_mode<synchronous>, transform_indices = @transform_1, window_bounds = array<i64: 32, 40>}, {pipeline_mode = #tpu.pipeline_mode<synchronous>, transform_indices = @transform_2, window_bounds = array<i64: 1, 40>}, {pipeline_mode = #tpu.pipeline_mode<synchronous>, transform_indices = @transform_3, window_bounds = array<i64: 40, 4>}, {pipeline_mode = #tpu.pipeline_mode<synchronous>, transform_indices = @transform_4, window_bounds = array<i64: 1, 4>}, {transform_indices = @transform_5, window_bounds = array<i64: 8, 4>}]} {
    %c0 = arith.constant 0 : index
    %c0_0 = arith.constant 0 : index
    %0 = vector.load %arg1[%c0, %c0_0] : memref<8x32xf32, #tpu.memory_space<vmem>>, vector<8x32xf32>
    %c0_1 = arith.constant 0 : index
    %c0_2 = arith.constant 0 : index
    %1 = vector.load %arg2[%c0_1, %c0_2] : memref<32x40xf32, #tpu.memory_space<vmem>>, vector<32x40xf32>
    %cst = arith.constant dense<0.000000e+00> : vector<8x40xf32>
    %2 = tpu.matmul %0, %1, %cst {dimension_numbers = #tpu.dot_dimension_numbers<[1], [0], [0], [1], [0, 0, 1, 1], [], []>} : vector<8x32xf32>, vector<32x40xf32>, vector<8x40xf32> -> vector<8x40xf32>
    %c0_3 = arith.constant 0 : index
    %c0_4 = arith.constant 0 : index
    %3 = vector.load %arg3[%c0_3, %c0_4] : memref<1x40xf32, #tpu.memory_space<vmem>>, vector<1x40xf32>
    %4 = vector.broadcast %3 : vector<1x40xf32> to vector<8x40xf32>
    %5 = arith.addf %2, %4 : vector<8x40xf32>
    %cst_5 = arith.constant 0.000000e+00 : f32
    %6 = vector.broadcast %cst_5 : f32 to vector<8x40xf32>
    %7 = arith.maximumf %5, %6 : vector<8x40xf32>
    %c0_6 = arith.constant 0 : index
    %c0_7 = arith.constant 0 : index
    %8 = vector.load %arg4[%c0_6, %c0_7] : memref<40x4xf32, #tpu.memory_space<vmem>>, vector<40x4xf32>
    %cst_8 = arith.constant dense<0.000000e+00> : vector<8x4xf32>
    %9 = tpu.matmul %7, %8, %cst_8 {dimension_numbers = #tpu.dot_dimension_numbers<[1], [0], [0], [1], [0, 0, 1, 1], [], []>} : vector<8x40xf32>, vector<40x4xf32>, vector<8x4xf32> -> vector<8x4xf32>
    %c0_9 = arith.constant 0 : index
    %c0_10 = arith.constant 0 : index
    %10 = vector.load %arg5[%c0_9, %c0_10] : memref<1x4xf32, #tpu.memory_space<vmem>>, vector<1x4xf32>
    %11 = vector.broadcast %10 : vector<1x4xf32> to vector<8x4xf32>
    %12 = arith.addf %9, %11 : vector<8x4xf32>
    %cst_11 = arith.constant dense<0xFF800000> : vector<8xf32>
    %13 = vector.multi_reduction <maximumf>, %12, %cst_11 [1] : vector<8x4xf32> to vector<8xf32>
    %14 = vector.shape_cast %13 : vector<8xf32> to vector<8x1xf32>
    %15 = vector.broadcast %14 : vector<8x1xf32> to vector<8x4xf32>
    %16 = arith.subf %12, %15 : vector<8x4xf32>
    %17 = math.exp %16 : vector<8x4xf32>
    %cst_12 = arith.constant dense<0.000000e+00> : vector<8xf32>
    %18 = vector.multi_reduction <add>, %17, %cst_12 [1] : vector<8x4xf32> to vector<8xf32>
    %19 = vector.shape_cast %18 : vector<8xf32> to vector<8x1xf32>
    %20 = math.log %19 : vector<8x1xf32>
    %21 = vector.broadcast %20 : vector<8x1xf32> to vector<8x4xf32>
    %22 = arith.subf %16, %21 : vector<8x4xf32>
    %c0_13 = arith.constant 0 : index
    %c0_14 = arith.constant 0 : index
    %23 = vector.load %arg6[%c0_13, %c0_14] : memref<8x4xf32, #tpu.memory_space<vmem>>, vector<8x4xf32>
    tpu.vector_store %arg6[%c0_13, %c0_14], %22 {strides = array<i32>} : memref<8x4xf32, #tpu.memory_space<vmem>>, vector<8x4xf32>,
    return
  }
  func.func @transform_0(%arg0: i32) -> (i32, i32) {
    %c0_i32 = arith.constant 0 : i32
    %c0_i32_0 = arith.constant 0 : i32
    return %arg0, %c0_i32 : i32, i32
  }
  func.func @transform_1(%arg0: i32) -> (i32, i32) {
    %c0_i32 = arith.constant 0 : i32
    %c0_i32_0 = arith.constant 0 : i32
    %c0_i32_1 = arith.constant 0 : i32
    return %c0_i32, %c0_i32_0 : i32, i32
  }
  func.func @transform_2(%arg0: i32) -> (i32, i32) {
    %c0_i32 = arith.constant 0 : i32
    %c0_i32_0 = arith.constant 0 : i32
    %c0_i32_1 = arith.constant 0 : i32
    return %c0_i32, %c0_i32_0 : i32, i32
  }
  func.func @transform_3(%arg0: i32) -> (i32, i32) {
    %c0_i32 = arith.constant 0 : i32
    %c0_i32_0 = arith.constant 0 : i32
    %c0_i32_1 = arith.constant 0 : i32
    return %c0_i32, %c0_i32_0 : i32, i32
  }
  func.func @transform_4(%arg0: i32) -> (i32, i32) {
    %c0_i32 = arith.constant 0 : i32
    %c0_i32_0 = arith.constant 0 : i32
    %c0_i32_1 = arith.constant 0 : i32
    return %c0_i32, %c0_i32_0 : i32, i32
  }
  func.func @transform_5(%arg0: i32) -> (i32, i32) {
    %c0_i32 = arith.constant 0 : i32
    %c0_i32_0 = arith.constant 0 : i32
    return %arg0, %c0_i32 : i32, i32
  }
}

</mosaic_0001>

<bundles_post_ra>
// kernel: tpu_custom_call.1
= control target key start
LH: loop header
LB: loop body
LE: loop exit
PB: predicated region body
PF: predicated region fallthrough
CT: control target
= control target key end

     0   :  { %10 = vsyncpa [#allocation3], 0  ;;  %s1409_s0 = inlined_call_operand.vmem [shape: f32[256,32], index: 0, kind: input, shape index: {}]   ;;  %s1410_s1 = inlined_call_operand.vmem [shape: f32[32,40], index: 1, kind: input, shape index: {}]   ;;  %s1411_s2 = inlined_call_operand.vmem [shape: f32[1,40], index: 2, kind: input, shape index: {}]   ;;  %s1412_s3 = inlined_call_operand.vmem [shape: f32[40,4], index: 3, kind: input, shape index: {}]   ;;  %s1413_s4 = inlined_call_operand.vmem [shape: f32[1,4], index: 4, kind: input, shape index: {}]   ;;  %s1414_s5 = inlined_call_operand.hbm [shape: f32[4,256], index: 5, kind: output, shape index: {}]  }
   0x1   :  { %12 = vsyncpa [#allocation3 + $0x1], 0  ;;  %s1054_s18 = smov 0   ;;  %s1056_s19 = smov 0  }
   0x2   :  { %s1058_s20 = smov 0   ;;  %s1060_s21 = smov 0  }
   0x3 LB: > { %s1075_s22 = sadd.s32 4294967295, %s1022_s21   ;;  %s803_s23 = sadd.s32 4294967294, %s1022_s21   ;;  %s1022_s21 = sphi %s1060_s21, %s1420_s21   ;;  %s1018_s20 = sphi %s1058_s20, %s1419_s20   ;;  %s1014_s19 = sphi %s1056_s19, %s1418_s19   ;;  %s1010_s18 = sphi %s1054_s18, %s1417_s18  }
   0x4   : > { %s1079_s24 = sadd.s32 1, %s1022_s21   ;;  %s135_s25 = sadd.s32 1, %s1018_s20 }
   0x5   : > { %s132_s26 = ssub.s32 %s1022_s21, %s1079_s24  ;;  %p145_p0 = scmp.ne.s32.totalorder %s1018_s20, %s1014_s19 }
   0x6   : > { %p133_p1 = scmp.eq.s32.totalorder %s132_s26, 0  ;;  %p146_p2 = scmp.eq.s32.totalorder %s1075_s22, 1 }
   0x7   : > { %p151_p3 = scmp.ne.s32.totalorder %s1014_s19, %s1010_s18  ;;  %p152_p4 = scmp.eq.s32.totalorder %s803_s23, 1 }
   0x8   : > { %s1090_s27 = scalar_select %p133_p1, %s1018_s20, %s135_s25  }
   0x9   : > { %p1092_p5 = por %p146_p2, %p145_p0  ;;  %p1096_p6 = por %p152_p4, %p151_p3 }
   0xa   : > { %p806_p7 = scmp.ge.s32.totalorder %s1022_s21, 1  ;;  %p191_p8 = scmp.lt.s32.totalorder %s1022_s21, 3 }
   0xc   : > { %p192_p9 = pnand %p806_p7, %p191_p8 }
   0xd   : > { %s808_s9 = sshll.u32 (!%p192_p9), %s1075_s22, 4  ;;  %s216_s16 = sand.u32 (!%p192_p9), 1, %s1014_s19  }
   0xe   : > { %195 = sbr.rel (%p192_p9) target bundleno = 722 (0x2d2), region = 40  ;;  %p220_p10 = scmp.lt.s32.totalorder (!%p192_p9), %s808_s9, 31 }
   0xf   : > { %s843_s23 = sshll.u32 (!%p192_p9), %s1075_s22, 2  ;;  %s980_s13 = scalar_lea.hbm (!%p192_p9), %s1414_s5, 8 }
  0x10   : > { %s739_s30 = scalar_lea.hbm (!%p192_p9), %s1414_s5, %s843_s23 }
  0x11   : > { %s743_s8 = sshll.u32 (!%p192_p9), %s739_s30, 4  ;;  %s744_s8 = int_to_ptr.hbm [resolvable:$true] %s743_s8 }
  0x12   : > { %s974_s10 = sshra.s32 (!%p192_p9), %s744_s8, 4  ;;  %s975_s10 = int_to_ptr.hbm [resolvable:$true] %s974_s10 }
  0x13   : > { %v244_v0 = vld [vmem:[%s1410_s1 + $0x18] sm:$0xff]  ;;  %v243_v1 = vld [vmem:[%s1410_s1 + $0x10] sm:$0xff]  ;;  %v242_v2 = vld [vmem:[%s1410_s1 + $0x8] sm:$0xff]  ;;  %s1422_s9 = smov (!%p220_p10, %s808_s9), 31  ;;  %vm249_vm0 = vcmask 261120   ;;  %vm388_vm1 = vcmask 326656   ;;  %p981_p0 = scmp.lt.s32.totalorder %s975_s10, %s1414_s5 }
  0x14   : > { %310 = vmatpush.msra.mxu0 %v244_v0  ;;  %846 = vmatpush.msra.mxu3 %v244_v0  ;;  %v241_v3 = vld [vmem:[%s1410_s1] sm:$0xff]  ;;  %s809_s14 = sshll.u32 %s1422_s9, 3  ;;  %v382_v15 = vld [vmem:[%s1412_s3 + $0x18] sm:$0xff]  ;;  %v381_v22 = vld [vmem:[%s1412_s3 + $0x10] sm:$0xff]  ;;  %vm502_vm2 = vcmask 31744   ;;  %s729_s9 = scalar_lea.sflag [#allocation3], %s216_s16 }
  0x15   : > { %s1118_s17 = scalar_lea.vmem %s1409_s0, %s809_s14  ;;  %v383_v14 = vld [vmem:[%s1412_s3 + $0x20] sm:$0xff]  ;;  %v380_v23 = vld [vmem:[%s1412_s3 + $0x8] sm:$0xff]  ;;  %s976_s11 = scalar_lea.hbm %s975_s10, 4 }
  0x16   : > { %311 = vmatpush.msra.mxu0 %v243_v1  ;;  %847 = vmatpush.msra.mxu3 %v243_v1  ;;  %v225_v4 = vld [vmem:[%s1118_s17] sm:$0xff]  ;;  %v226_v5 = vld [vmem:[%s1118_s17 + $0x8] sm:$0xff]  ;;  %v227_v6 = vld [vmem:[%s1118_s17 + $0x10] sm:$0xff]  ;;  %p977_p11 = scmp.ne.s32.totalorder %s975_s10, %s976_s11  ;;  %p982_p1 = scmp.lt.s32.totalorder %s980_s13, %s976_s11 }
  0x17   : > { %v228_v7 = vld [vmem:[%s1118_s17 + $0x18] sm:$0xff]  ;;  %v229_v8 = vld [vmem:[%s1118_s17 + $0x20] sm:$0xff]  ;;  %v234_v9 = vld [vmem:[%s1118_s17 + $0x48] sm:$0xff]  ;;  %448 = vmatpush.msra.mxu1 %v383_v14  ;;  %850 = vmatpush.msra.mxu2 %v383_v14 }
  0x18   : > { %312 = vmatpush.msra.mxu0 %v242_v2  ;;  %848 = vmatpush.msra.mxu3 %v242_v2  ;;  %v230_v10 = vld [vmem:[%s1118_s17 + $0x28] sm:$0xff]  ;;  %v235_v11 = vld [vmem:[%s1118_s17 + $0x50] sm:$0xff]  ;;  %v236_v13 = vld [vmem:[%s1118_s17 + $0x58] sm:$0xff]  ;;  %p978_p12 = pnand %p977_p11, %p1092_p5  ;;  %p983_p2 = por %p982_p1, %p981_p0 }
  0x19   : > { %v231_v12 = vld [vmem:[%s1118_s17 + $0x30] sm:$0xff]  ;;  %449 = vmatpush.msra.mxu1 %v382_v15  ;;  %851 = vmatpush.msra.mxu2 %v382_v15  ;;  %v232_v16 = vld [vmem:[%s1118_s17 + $0x38] sm:$0xff]  ;;  %v237_v17 = vld [vmem:[%s1118_s17 + $0x60] sm:$0xff] }
  0x1a   : > { %313 = vmatpush.msra.mxu0 %v241_v3  ;;  %849 = vmatpush.msra.mxu3 %v241_v3  ;;  %v233_v18 = vld [vmem:[%s1118_s17 + $0x40] sm:$0xff]  ;;  %v238_v19 = vld [vmem:[%s1118_s17 + $0x68] sm:$0xff]  ;;  %v239_v20 = vld [vmem:[%s1118_s17 + $0x70] sm:$0xff]  ;;  %p979_p13 = pneg %p978_p12 }
  0x1b   : > { %810 = vmatmul.msk.f32.vlgmr.msra.gmra.mxu0 %vm249_vm0, %v225_v4  ;;  %819 = vmatmul.msk.f32.vlgmr.msra.gmra.mxu3 %vm249_vm0, %v234_v9  ;;  %v240_v21 = vld [vmem:[%s1118_s17 + $0x78] sm:$0xff]  ;;  %v379_v24 = vld [vmem:[%s1412_s3] sm:$0xff]  ;;  %s807_s17 = sshll.u32 %s216_s16, 2 }
  0x1c   : > { %450 = vmatpush.msra.mxu1 %v381_v22  ;;  %852 = vmatpush.msra.mxu2 %v381_v22  ;;  %v1170_v25 = vld [vmem:[%s1411_s2] ss:$0 sm:$0xff]  ;;  %s218_s6 = scalar_lea.vmem [#allocation2], %s807_s17  ;;  %p984_p3 = pnand %p983_p2, %p979_p13 }
  0x1d   : > { %s741_s7 = sshll.u32 %s218_s6, 4  ;;  %s742_s7 = int_to_ptr.vmem [resolvable:$true] %s741_s7 }
  0x1e   : > { %451 = vmatpush.msra.mxu1 %v380_v23  ;;  %853 = vmatpush.msra.mxu2 %v380_v23 }
  0x20   : > { %452 = vmatpush.msra.mxu1 %v379_v24  ;;  %854 = vmatpush.msra.mxu2 %v379_v24 }
  0x23   : > { %811 = vmatmul.msk.f32.gmra.mxu0 %vm249_vm0, %v226_v5  ;;  %820 = vmatmul.msk.f32.gmra.mxu3 %vm249_vm0, %v235_v11 }
  0x2b   : > { %812 = vmatmul.msk.f32.gmra.mxu0 %vm249_vm0, %v227_v6  ;;  %821 = vmatmul.msk.f32.gmra.mxu3 %vm249_vm0, %v236_v13 }
  0x33   : > { %813 = vmatmul.msk.f32.gmra.mxu0 %vm249_vm0, %v228_v7  ;;  %822 = vmatmul.msk.f32.gmra.mxu3 %vm249_vm0, %v237_v17 }
  0x3b   : > { %814 = vmatmul.msk.f32.gmra.mxu0 %vm249_vm0, %v229_v8  ;;  %823 = vmatmul.msk.f32.gmra.mxu3 %vm249_vm0, %v238_v19 }
  0x43   : > { %815 = vmatmul.msk.f32.gmra.mxu0 %vm249_vm0, %v230_v10  ;;  %824 = vmatmul.msk.f32.gmra.mxu3 %vm249_vm0, %v239_v20  ;;  %v1207_v10 = vld [vmem:[%s1413_s4] ss:$0 sm:$0xff] }
  0x4b   : > { %816 = vmatmul.msk.f32.gmra.mxu0 %vm249_vm0, %v231_v12  ;;  %825 = vmatmul.msk.f32.gmra.mxu3 %vm249_vm0, %v240_v21 }
  0x53   : > { %817 = vmatmul.msk.f32.gmra.mxu0 %vm249_vm0, %v232_v16 }
  0x5b   : > { %818 = vmatmul.msk.f32.gmra.mxu0 %vm249_vm0, %v233_v18 }
  0x98   : > { %v315_v26 = vpop.f32.mrf.mxu0 }
  0x99   : > { %v316_v27 = vadd.f32 %v1170_v25, %v315_v26 }
  0x9b   : > { %v363_v28 = vmax.f32 %v316_v27, 0.0 }
  0x9d   : > { %826 = vmatmul.msk.f32.vlgmr.msra.gmra.mxu1 %vm388_vm1, %v363_v28 }
  0x9e   : > { %v342_v47 = vpop.f32.mrf.mxu3 }
  0x9f   : > { %v343_v55 = vadd.f32 %v1170_v25, %v342_v47 }
  0xa0   : > { %v318_v29 = vpop.f32.mrf.mxu0 }
  0xa1   : > { %v319_v30 = vadd.f32 %v1170_v25, %v318_v29  ;;  %v372_v56 = vmax.f32 %v343_v55, 0.0 }
  0xa3   : > { %v364_v31 = vmax.f32 %v319_v30, 0.0 }
  0xa5   : > { %827 = vmatmul.msk.f32.gmra.mxu1 %vm388_vm1, %v364_v31 }
  0xa6   : > { %v345_v52 = vpop.f32.mrf.mxu3 }
  0xa7   : > { %v346_v58 = vadd.f32 %v1170_v25, %v345_v52 }
  0xa8   : > { %v321_v32 = vpop.f32.mrf.mxu0 }
  0xa9   : > { %v322_v33 = vadd.f32 %v1170_v25, %v321_v32  ;;  %v373_v59 = vmax.f32 %v346_v58, 0.0 }
  0xab   : > { %v365_v34 = vmax.f32 %v322_v33, 0.0 }
  0xad   : > { %828 = vmatmul.msk.f32.gmra.mxu1 %vm388_vm1, %v365_v34 }
  0xae   : > { %v348_v57 = vpop.f32.mrf.mxu3 }
  0xaf   : > { %v349_v61 = vadd.f32 %v1170_v25, %v348_v57 }
  0xb0   : > { %v324_v35 = vpop.f32.mrf.mxu0 }
  0xb1   : > { %v325_v36 = vadd.f32 %v1170_v25, %v324_v35  ;;  %v374_v62 = vmax.f32 %v349_v61, 0.0 }
  0xb3   : > { %v366_v37 = vmax.f32 %v325_v36, 0.0 }
  0xb5   : > { %829 = vmatmul.msk.f32.gmra.mxu1 %vm388_vm1, %v366_v37 }
  0xb6   : > { %v351_v60 = vpop.f32.mrf.mxu3 }
  0xb7   : > { %v352_v63 = vadd.f32 %v1170_v25, %v351_v60 }
  0xb8   : > { %v327_v38 = vpop.f32.mrf.mxu0 }
  0xb9   : > { %v328_v39 = vadd.f32 %v1170_v25, %v327_v38  ;;  %v375_v1 = vmax.f32 %v352_v63, 0.0 }
  0xbb   : > { %v367_v40 = vmax.f32 %v328_v39, 0.0 }
  0xbd   : > { %830 = vmatmul.msk.f32.gmra.mxu1 %vm388_vm1, %v367_v40 }
  0xbe   : > { %v354_v0 = vpop.f32.mrf.mxu3 }
  0xbf   : > { %v355_v2 = vadd.f32 %v1170_v25, %v354_v0 }
  0xc0   : > { %v330_v41 = vpop.f32.mrf.mxu0 }
  0xc1   : > { %v331_v42 = vadd.f32 %v1170_v25, %v330_v41  ;;  %v376_v4 = vmax.f32 %v355_v2, 0.0 }
  0xc3   : > { %v368_v43 = vmax.f32 %v331_v42, 0.0 }
  0xc5   : > { %831 = vmatmul.msk.f32.gmra.mxu1 %vm388_vm1, %v368_v43 }
  0xc6   : > { %v357_v3 = vpop.f32.mrf.mxu3 }
  0xc7   : > { %v358_v5 = vadd.f32 %v1170_v25, %v357_v3 }
  0xc8   : > { %v333_v44 = vpop.f32.mrf.mxu0 }
  0xc9   : > { %v334_v45 = vadd.f32 %v1170_v25, %v333_v44  ;;  %v377_v6 = vmax.f32 %v358_v5, 0.0 }
  0xcb   : > { %v369_v46 = vmax.f32 %v334_v45, 0.0 }
  0xcd   : > { %832 = vmatmul.msk.f32.gmra.mxu1 %vm388_vm1, %v369_v46 }
  0xce   : > { %v360_v7 = vpop.f32.mrf.mxu3 }
  0xcf   : > { %v361_v8 = vadd.f32 %v1170_v25, %v360_v7 }
  0xd0   : > { %v336_v48 = vpop.f32.mrf.mxu0 }
  0xd1   : > { %v337_v49 = vadd.f32 %v1170_v25, %v336_v48  ;;  %v378_v9 = vmax.f32 %v361_v8, 0.0 }
  0xd3   : > { %v370_v50 = vmax.f32 %v337_v49, 0.0 }
  0xd5   : > { %833 = vmatmul.msk.f32.gmra.mxu1 %vm388_vm1, %v370_v50 }
  0xd8   : > { %v339_v51 = vpop.f32.mrf.mxu0 }
  0xd9   : > { %v340_v53 = vadd.f32 %v1170_v25, %v339_v51 }
  0xdb   : > { %v371_v54 = vmax.f32 %v340_v53, 0.0 }
  0xdd   : > { %834 = vmatmul.msk.f32.vlgmr.msra.gmra.mxu2 %vm388_vm1, %v371_v54 }
  0xe5   : > { %835 = vmatmul.msk.f32.gmra.mxu2 %vm388_vm1, %v372_v56 }
  0xed   : > { %836 = vmatmul.msk.f32.gmra.mxu2 %vm388_vm1, %v373_v59 }
  0xf5   : > { %837 = vmatmul.msk.f32.gmra.mxu2 %vm388_vm1, %v374_v62 }
  0xfd   : > { %838 = vmatmul.msk.f32.gmra.mxu2 %vm388_vm1, %v375_v1 }
 0x105   : > { %839 = vmatmul.msk.f32.gmra.mxu2 %vm388_vm1, %v376_v4 }
 0x10d   : > { %840 = vmatmul.msk.f32.gmra.mxu2 %vm388_vm1, %v377_v6 }
 0x115   : > { %841 = vmatmul.msk.f32.gmra.mxu2 %vm388_vm1, %v378_v9 }
 0x11a   : > { %v454_v11 = vpop.f32.mrf.mxu1 }
 0x11b   : > { %v455_v12 = vadd.f32 %v1207_v10, %v454_v11 }
 0x11d   : > { %v503_v13 = vsel %vm502_vm2, %v455_v12, -inf }
 0x11e   : > { %504 = vmax.xlane.f32.xlu0 %v503_v13 }
 0x122   : > { %v457_v14 = vpop.f32.mrf.mxu1 }
 0x123   : > { %v458_v15 = vadd.f32 %v1207_v10, %v457_v14 }
 0x125   : > { %v506_v16 = vsel %vm502_vm2, %v458_v15, -inf }
 0x126   : > { %507 = vmax.xlane.f32.xlu0 %v506_v16 }
 0x12a   : > { %v460_v17 = vpop.f32.mrf.mxu1 }
 0x12b   : > { %v1214_v18 = vadd.f32 %v1207_v10, %v460_v17 }
 0x12d   : > { %v509_v19 = vsel %vm502_vm2, %v1214_v18, -inf }
 0x12e   : > { %510 = vmax.xlane.f32.xlu1 %v509_v19 }
 0x132   : > { %v463_v20 = vpop.f32.mrf.mxu1 }
 0x133   : > { %v1219_v21 = vadd.f32 %v1207_v10, %v463_v20 }
 0x135   : > { %v512_v22 = vsel %vm502_vm2, %v1219_v21, -inf }
 0x136   : > { %513 = vmax.xlane.f32.xlu1 %v512_v22 }
 0x13a   : > { %v466_v23 = vpop.f32.mrf.mxu1 }
 0x13b   : > { %v1224_v24 = vadd.f32 %v1207_v10, %v466_v23 }
 0x13d   : > { %v515_v25 = vsel %vm502_vm2, %v1224_v24, -inf }
 0x13e   : > { %516 = vmax.xlane.f32.xlu2 %v515_v25 }
 0x142   : > { %v469_v26 = vpop.f32.mrf.mxu1 }
 0x143   : > { %v1229_v27 = vadd.f32 %v1207_v10, %v469_v26 }
 0x145   : > { %v518_v28 = vsel %vm502_vm2, %v1229_v27, -inf }
 0x146   : > { %519 = vmax.xlane.f32.xlu2 %v518_v28 }
 0x14a   : > { %v472_v29 = vpop.f32.mrf.mxu1 }
 0x14b   : > { %v1234_v30 = vadd.f32 %v1207_v10, %v472_v29 }
 0x14d   : > { %v521_v31 = vsel %vm502_vm2, %v1234_v30, -inf }
 0x14e   : > { %522 = vmax.xlane.f32.xlu0 %v521_v31 }
 0x152   : > { %v475_v32 = vpop.f32.mrf.mxu1 }
 0x153   : > { %v1239_v33 = vadd.f32 %v1207_v10, %v475_v32 }
 0x155   : > { %v524_v34 = vsel %vm502_vm2, %v1239_v33, -inf }
 0x156   : > { %525 = vmax.xlane.f32.xlu1 %v524_v34 }
 0x160   : > { %v478_v35 = vpop.f32.mrf.mxu2 }
 0x161   : > { %v1244_v36 = vadd.f32 %v1207_v10, %v478_v35 }
 0x163   : > { %v527_v37 = vsel %vm502_vm2, %v1244_v36, -inf }
 0x164   : > { %528 = vmax.xlane.f32.xlu2 %v527_v37 }
 0x168   : > { %v481_v38 = vpop.f32.mrf.mxu2 }
 0x169   : > { %v1249_v39 = vadd.f32 %v1207_v10, %v481_v38 }
 0x16b   : > { %v530_v40 = vsel %vm502_vm2, %v1249_v39, -inf }
 0x16c   : > { %531 = vmax.xlane.f32.xlu0 %v530_v40 }
 0x170   : > { %v484_v41 = vpop.f32.mrf.mxu2 }
 0x171   : > { %v1254_v42 = vadd.f32 %v1207_v10, %v484_v41 }
 0x173   : > { %v533_v43 = vsel %vm502_vm2, %v1254_v42, -inf }
 0x174   : > { %534 = vmax.xlane.f32.xlu1 %v533_v43 }
 0x178   : > { %v487_v44 = vpop.f32.mrf.mxu2 }
 0x179   : > { %v1259_v45 = vadd.f32 %v1207_v10, %v487_v44 }
 0x17b   : > { %v536_v46 = vsel %vm502_vm2, %v1259_v45, -inf }
 0x17c   : > { %537 = vmax.xlane.f32.xlu2 %v536_v46 }
 0x180   : > { %v490_v47 = vpop.f32.mrf.mxu2 }
 0x181   : > { %v1264_v48 = vadd.f32 %v1207_v10, %v490_v47 }
 0x183   : > { %v539_v49 = vsel %vm502_vm2, %v1264_v48, -inf }
 0x184   : > { %540 = vmax.xlane.f32.xlu0 %v539_v49 }
 0x188   : > { %v493_v50 = vpop.f32.mrf.mxu2 }
 0x189   : > { %v1269_v51 = vadd.f32 %v1207_v10, %v493_v50 }
 0x18b   : > { %v542_v52 = vsel %vm502_vm2, %v1269_v51, -inf }
 0x18c   : > { %543 = vmax.xlane.f32.xlu1 %v542_v52 }
 0x190   : > { %v496_v53 = vpop.f32.mrf.mxu2 }
 0x191   : > { %v1274_v54 = vadd.f32 %v1207_v10, %v496_v53  ;;  %v505_v55 = vpop.xlane.xlu0 %504 }
 0x192   : > { %v1276_v56 = vsub.f32 %v455_v12, %v505_v55 }
 0x193   : > { %v545_v57 = vsel %vm502_vm2, %v1274_v54, -inf }
 0x194   : > { %v567_v58 = vmul.f32 1.442695, %v1276_v56  ;;  %546 = vmax.xlane.f32.xlu2 %v545_v57 }
 0x196   : > { %896 = vpow2.f32 %v567_v58 }
 0x198   : > { %v499_v59 = vpop.f32.mrf.mxu2 }
 0x199   : > { %v1282_v60 = vadd.f32 %v1207_v10, %v499_v59  ;;  %v508_v61 = vpop.xlane.xlu0 %507 }
 0x19a   : > { %v1284_v62 = vsub.f32 %v458_v15, %v508_v61 }
 0x19b   : > { %v548_v63 = vsel %vm502_vm2, %v1282_v60, -inf }
 0x19c   : > { %v897_v0 = vpop.eup %896  ;;  %v569_v1 = vmul.f32 1.442695, %v1284_v62  ;;  %549 = vmax.xlane.f32.xlu0 %v548_v63 }
 0x19d   : > { %v599_v2 = vsel %vm502_vm2, %v897_v0, 0.0 }
 0x19e   : > { %898 = vpow2.f32 %v569_v1  ;;  %600 = vadd.xlane.f32.xlu1 %v599_v2 }
 0x1a1   : > { %v511_v3 = vpop.xlane.xlu1 %510 }
 0x1a2   : > { %v1291_v4 = vsub.f32 %v1214_v18, %v511_v3 }
 0x1a4   : > { %v899_v5 = vpop.eup %898  ;;  %v571_v6 = vmul.f32 1.442695, %v1291_v4 }
 0x1a5   : > { %v602_v7 = vsel %vm502_vm2, %v899_v5, 0.0 }
 0x1a6   : > { %900 = vpow2.f32 %v571_v6  ;;  %603 = vadd.xlane.f32.xlu2 %v602_v7 }
 0x1a9   : > { %v514_v8 = vpop.xlane.xlu1 %513 }
 0x1aa   : > { %v1296_v9 = vsub.f32 %v1219_v21, %v514_v8 }
 0x1ac   : > { %v901_v10 = vpop.eup %900  ;;  %v573_v11 = vmul.f32 1.442695, %v1296_v9 }
 0x1ad   : > { %v605_v12 = vsel %vm502_vm2, %v901_v10, 0.0 }
 0x1ae   : > { %902 = vpow2.f32 %v573_v11  ;;  %606 = vadd.xlane.f32.xlu0 %v605_v12 }
 0x1b1   : > { %v517_v13 = vpop.xlane.xlu2 %516 }
 0x1b2   : > { %v1301_v14 = vsub.f32 %v1224_v24, %v517_v13 }
 0x1b4   : > { %v903_v15 = vpop.eup %902  ;;  %v575_v16 = vmul.f32 1.442695, %v1301_v14 }
 0x1b5   : > { %v608_v17 = vsel %vm502_vm2, %v903_v15, 0.0 }
 0x1b6   : > { %904 = vpow2.f32 %v575_v16  ;;  %609 = vadd.xlane.f32.xlu1 %v608_v17 }
 0x1b9   : > { %v520_v18 = vpop.xlane.xlu2 %519 }
 0x1ba   : > { %v1306_v19 = vsub.f32 %v1229_v27, %v520_v18 }
 0x1bc   : > { %v905_v20 = vpop.eup %904  ;;  %v577_v21 = vmul.f32 1.442695, %v1306_v19 }
 0x1bd   : > { %v611_v22 = vsel %vm502_vm2, %v905_v20, 0.0 }
 0x1be   : > { %906 = vpow2.f32 %v577_v21  ;;  %612 = vadd.xlane.f32.xlu2 %v611_v22 }
 0x1c1   : > { %v523_v23 = vpop.xlane.xlu0 %522 }
 0x1c2   : > { %v1311_v24 = vsub.f32 %v1234_v30, %v523_v23 }
 0x1c4   : > { %v907_v25 = vpop.eup %906  ;;  %v579_v26 = vmul.f32 1.442695, %v1311_v24 }
 0x1c5   : > { %v614_v28 = vsel %vm502_vm2, %v907_v25, 0.0 }
 0x1c6   : > { %908 = vpow2.f32 %v579_v26  ;;  %615 = vadd.xlane.f32.xlu0 %v614_v28 }
 0x1c9   : > { %v526_v27 = vpop.xlane.xlu1 %525 }
 0x1ca   : > { %v1316_v29 = vsub.f32 %v1239_v33, %v526_v27 }
 0x1cc   : > { %v909_v31 = vpop.eup %908  ;;  %v581_v32 = vmul.f32 1.442695, %v1316_v29 }
 0x1cd   : > { %v617_v34 = vsel %vm502_vm2, %v909_v31, 0.0 }
 0x1ce   : > { %910 = vpow2.f32 %v581_v32  ;;  %618 = vadd.xlane.f32.xlu1 %v617_v34 }
 0x1d4   : > { %v911_v30 = vpop.eup %910 }
 0x1d5   : > { %v620_v35 = vsel %vm502_vm2, %v911_v30, 0.0 }
 0x1d6   : > { %621 = vadd.xlane.f32.xlu2 %v620_v35 }
 0x1d7   : > { %v529_v37 = vpop.xlane.xlu2 %528 }
 0x1d8   : > { %v1322_v38 = vsub.f32 %v1244_v36, %v529_v37 }
 0x1da   : > { %v583_v40 = vmul.f32 1.442695, %v1322_v38 }
 0x1dc   : > { %912 = vpow2.f32 %v583_v40 }
 0x1df   : > { %v532_v33 = vpop.xlane.xlu0 %531 }
 0x1e0   : > { %v1326_v41 = vsub.f32 %v1249_v39, %v532_v33 }
 0x1e2   : > { %v913_v43 = vpop.eup %912  ;;  %v585_v44 = vmul.f32 1.442695, %v1326_v41 }
 0x1e3   : > { %v623_v46 = vsel %vm502_vm2, %v913_v43, 0.0 }
 0x1e4   : > { %914 = vpow2.f32 %v585_v44  ;;  %624 = vadd.xlane.f32.xlu0 %v623_v46 }
 0x1e7   : > { %v535_v47 = vpop.xlane.xlu1 %534 }
 0x1e8   : > { %v1331_v49 = vsub.f32 %v1254_v42, %v535_v47 }
 0x1ea   : > { %v915_v36 = vpop.eup %914  ;;  %v587_v50 = vmul.f32 1.442695, %v1331_v49 }
 0x1eb   : > { %v626_v52 = vsel %vm502_vm2, %v915_v36, 0.0 }
 0x1ec   : > { %916 = vpow2.f32 %v587_v50  ;;  %627 = vadd.xlane.f32.xlu1 %v626_v52 }
 0x1ef   : > { %v538_v39 = vpop.xlane.xlu2 %537 }
 0x1f0   : > { %v1336_v53 = vsub.f32 %v1259_v45, %v538_v39 }
 0x1f2   : > { %v917_v55 = vpop.eup %916  ;;  %v589_v57 = vmul.f32 1.442695, %v1336_v53 }
 0x1f3   : > { %v629_v58 = vsel %vm502_vm2, %v917_v55, 0.0 }
 0x1f4   : > { %918 = vpow2.f32 %v589_v57  ;;  %630 = vadd.xlane.f32.xlu2 %v629_v58 }
 0x1f7   : > { %v541_v42 = vpop.xlane.xlu0 %540 }
 0x1f8   : > { %v1341_v59 = vsub.f32 %v1264_v48, %v541_v42 }
 0x1fa   : > { %v919_v61 = vpop.eup %918  ;;  %v591_v63 = vmul.f32 1.442695, %v1341_v59 }
 0x1fb   : > { %v632_v0 = vsel %vm502_vm2, %v919_v61, 0.0 }
 0x1fc   : > { %920 = vpow2.f32 %v591_v63  ;;  %633 = vadd.xlane.f32.xlu0 %v632_v0 }
 0x1ff   : > { %v544_v45 = vpop.xlane.xlu1 %543 }
 0x200   : > { %v1346_v1 = vsub.f32 %v1269_v51, %v544_v45 }
 0x202   : > { %v921_v2 = vpop.eup %920  ;;  %v593_v3 = vmul.f32 1.442695, %v1346_v1 }
 0x203   : > { %v635_v5 = vsel %vm502_vm2, %v921_v2, 0.0 }
 0x204   : > { %922 = vpow2.f32 %v593_v3  ;;  %636 = vadd.xlane.f32.xlu1 %v635_v5 }
 0x207   : > { %v547_v48 = vpop.xlane.xlu2 %546 }
 0x208   : > { %v1351_v6 = vsub.f32 %v1274_v54, %v547_v48 }
 0x20a   : > { %v923_v7 = vpop.eup %922  ;;  %v595_v8 = vmul.f32 1.442695, %v1351_v6 }
 0x20b   : > { %v638_v10 = vsel %vm502_vm2, %v923_v7, 0.0 }
 0x20c   : > { %924 = vpow2.f32 %v595_v8  ;;  %639 = vadd.xlane.f32.xlu2 %v638_v10 }
 0x20f   : > { %v550_v51 = vpop.xlane.xlu0 %549 }
 0x210   : > { %v1356_v11 = vsub.f32 %v1282_v60, %v550_v51 }
 0x211   : > { %v601_v17 = vpop.xlane.xlu1 %600 }
 0x212   : > { %v925_v12 = vpop.eup %924  ;;  %v597_v13 = vmul.f32 1.442695, %v1356_v11 }
 0x213   : > { %v641_v15 = vsel %vm502_vm2, %v925_v12, 0.0 }
 0x214   : > { %926 = vpow2.f32 %v597_v13  ;;  %642 = vadd.xlane.f32.xlu0 %v641_v15 }
 0x215   : > { %928 = vlog2.f32 %v601_v17 }
 0x219   : > { %v604_v18 = vpop.xlane.xlu2 %603 }
 0x21a   : > { %v927_v54 = vpop.eup %926  ;;  %930 = vlog2.f32 %v604_v18 }
 0x21b   : > { %v644_v16 = vsel %vm502_vm2, %v927_v54, 0.0  ;;  %v929_v20 = vpop.eup %928 }
 0x21c   : > { %645 = vadd.xlane.f32.xlu1 %v644_v16  ;;  %v648_v21 = vmul.f32 0.6931472, %v929_v20 }
 0x21e   : > { %v679_v60 = vsub.f32 %v1276_v56, %v648_v21 }
 0x220   : > { %v931_v23 = vpop.eup %930 }
 0x221   : > { %v607_v22 = vpop.xlane.xlu0 %606  ;;  %v650_v25 = vmul.f32 0.6931472, %v931_v23 }
 0x222   : > { %932 = vlog2.f32 %v607_v22 }
 0x223   : > { %v680_v28 = vsub.f32 %v1284_v62, %v650_v25 }
 0x228   : > { %v933_v27 = vpop.eup %932 }
 0x229   : > { %v610_v26 = vpop.xlane.xlu1 %609  ;;  %v652_v31 = vmul.f32 0.6931472, %v933_v27 }
 0x22a   : > { %934 = vlog2.f32 %v610_v26 }
 0x22b   : > { %v681_v34 = vsub.f32 %v1291_v4, %v652_v31 }
 0x230   : > { %v935_v30 = vpop.eup %934 }
 0x231   : > { %v613_v32 = vpop.xlane.xlu2 %612  ;;  %v654_v35 = vmul.f32 0.6931472, %v935_v30 }
 0x232   : > { %936 = vlog2.f32 %v613_v32 }
 0x233   : > { %v682_v56 = vsub.f32 %v1296_v9, %v654_v35 }
 0x235   : > { %695 = vxpose.xlu2.b32.start [1/16] (narrow) %v679_v60, 8 }
 0x238   : > { %v937_v40 = vpop.eup %936 }
 0x239   : > { %v616_v37 = vpop.xlane.xlu0 %615  ;;  %v656_v33 = vmul.f32 0.6931472, %v937_v40 }
 0x23a   : > { %938 = vlog2.f32 %v616_v37 }
 0x23b   : > { %v683_v62 = vsub.f32 %v1301_v14, %v656_v33 }
 0x23d   : > { %696 = vxpose.xlu2.b32.cont [2/16] (narrow) %v680_v28, 8 }
 0x240   : > { %v939_v44 = vpop.eup %938 }
 0x241   : > { %v619_v43 = vpop.xlane.xlu1 %618  ;;  %v658_v46 = vmul.f32 0.6931472, %v939_v44 }
 0x242   : > { %940 = vlog2.f32 %v619_v43 }
 0x243   : > { %v684_v4 = vsub.f32 %v1306_v19, %v658_v46 }
 0x245   : > { %697 = vxpose.xlu2.b32.cont [3/16] (narrow) %v681_v34, 8 }
 0x248   : > { %v941_v36 = vpop.eup %940 }
 0x249   : > { %v622_v47 = vpop.xlane.xlu2 %621  ;;  %v660_v50 = vmul.f32 0.6931472, %v941_v36 }
 0x24a   : > { %942 = vlog2.f32 %v622_v47 }
 0x24b   : > { %v685_v9 = vsub.f32 %v1311_v24, %v660_v50 }
 0x24d   : > { %698 = vxpose.xlu2.b32.cont [4/16] (narrow) %v682_v56, 8 }
 0x250   : > { %v943_v39 = vpop.eup %942 }
 0x251   : > { %v662_v55 = vmul.f32 0.6931472, %v943_v39 }
 0x253   : > { %v686_v14 = vsub.f32 %v1316_v29, %v662_v55 }
 0x255   : > { %699 = vxpose.xlu2.b32.cont [5/16] (narrow) %v683_v62, 8 }
 0x257   : > { %v625_v52 = vpop.xlane.xlu0 %624 }
 0x258   : > { %944 = vlog2.f32 %v625_v52 }
 0x25d   : > { %700 = vxpose.xlu2.b32.cont [6/16] (narrow) %v684_v4, 8 }
 0x25e   : > { %v945_v58 = vpop.eup %944 }
 0x25f   : > { %v628_v57 = vpop.xlane.xlu1 %627  ;;  %v664_v42 = vmul.f32 0.6931472, %v945_v58 }
 0x260   : > { %946 = vlog2.f32 %v628_v57 }
 0x261   : > { %v687_v19 = vsub.f32 %v1322_v38, %v664_v42 }
 0x265   : > { %701 = vxpose.xlu2.b32.cont [7/16] (narrow) %v685_v9, 8 }
 0x266   : > { %v947_v63 = vpop.eup %946 }
 0x267   : > { %v631_v61 = vpop.xlane.xlu2 %630  ;;  %v666_v0 = vmul.f32 0.6931472, %v947_v63 }
 0x268   : > { %948 = vlog2.f32 %v631_v61 }
 0x269   : > { %v688_v24 = vsub.f32 %v1326_v41, %v666_v0 }
 0x26d   : > { %702 = vxpose.xlu2.b32.cont [8/16] (narrow) %v686_v14, 8 }
 0x26e   : > { %v949_v2 = vpop.eup %948 }
 0x26f   : > { %v634_v45 = vpop.xlane.xlu0 %633  ;;  %v668_v3 = vmul.f32 0.6931472, %v949_v2 }
 0x270   : > { %950 = vlog2.f32 %v634_v45 }
 0x271   : > { %v689_v29 = vsub.f32 %v1331_v49, %v668_v3 }
 0x275   : > { %703 = vxpose.xlu2.b32.cont [9/16] (narrow) %v687_v19, 8 }
 0x276   : > { %v951_v48 = vpop.eup %950 }
 0x277   : > { %v637_v5 = vpop.xlane.xlu1 %636  ;;  %v670_v7 = vmul.f32 0.6931472, %v951_v48 }
 0x278   : > { %952 = vlog2.f32 %v637_v5 }
 0x279   : > { %v690_v38 = vsub.f32 %v1336_v53, %v670_v7 }
 0x27d   : > { %704 = vxpose.xlu2.b32.cont [10/16] (narrow) %v688_v24, 8 }
 0x27e   : > { %v953_v10 = vpop.eup %952 }
 0x27f   : > { %v640_v8 = vpop.xlane.xlu2 %639  ;;  %v672_v51 = vmul.f32 0.6931472, %v953_v10 }
 0x280   : > { %954 = vlog2.f32 %v640_v8 }
 0x281   : > { %v691_v41 = vsub.f32 %v1341_v59, %v672_v51 }
 0x285   : > { %705 = vxpose.xlu2.b32.cont [11/16] (narrow) %v689_v29, 8 }
 0x286   : > { %v955_v13 = vpop.eup %954 }
 0x287   : > { %v643_v12 = vpop.xlane.xlu0 %642  ;;  %v674_v49 = vmul.f32 0.6931472, %v955_v13 }
 0x288   : > { %956 = vlog2.f32 %v643_v12 }
 0x289   : > { %v692_v54 = vsub.f32 %v1346_v1, %v674_v49 }
 0x28d   : > { %706 = vxpose.xlu2.b32.cont [12/16] (narrow) %v690_v38, 8 }
 0x28e   : > { %v957_v16 = vpop.eup %956 }
 0x28f   : > { %v646_v15 = vpop.xlane.xlu1 %645  ;;  %v676_v53 = vmul.f32 0.6931472, %v957_v16 }
 0x290   : > { %958 = vlog2.f32 %v646_v15 }
 0x291   : > { %v693_v17 = vsub.f32 %v1351_v6, %v676_v53 }
 0x295   : > { %707 = vxpose.xlu2.b32.cont [13/16] (narrow) %v691_v41, 8 }
 0x296   : > { %v959_v18 = vpop.eup %958 }
 0x297   : > { %v678_v20 = vmul.f32 0.6931472, %v959_v18 }
 0x299   : > { %v694_v59 = vsub.f32 %v1356_v11, %v678_v20 }
 0x29d   : > { %708 = vxpose.xlu2.b32.cont [14/16] (narrow) %v692_v54, 8 }
 0x2a5   : > { %709 = vxpose.xlu2.b32.cont [15/16] (narrow) %v693_v17, 8 }
 0x2ad   : > { %710 = vxpose.xlu2.b32.end [16/16] (narrow) %v694_v59, 8 }
 0x2ce   : > { %v711_v1 = vpop.trf.xlu2 }
 0x2cf   : > { %727 = vst [vmem:[%s218_s6] sm:$0xf] %v711_v1 }
 0x2d0   : > { %987 = shalt.err (!%p984_p3)
}
 0x2d1   : > { %855 = dma.vmem_to_hbm [thread:$0]  (%p1092_p5), %s742_s7, 64, %s744_s8, %s729_s9  }
 0x2d2 PF: > { %p861_p4 = scmp.ge.s32.totalorder %s1022_s21, 2  ;;  %s755_s16 = sand.u32 1, %s1010_s18  }
 0x2d3   : > { %s756_s17 = scalar_lea.sflag [#allocation3], %s755_s16 }
 0x2d4   : > { %p858_p7 = pnand %p861_p4, %p1096_p6 }
 0x2d6   : > { %p859_p8 = pneg %p858_p7 }
 0x2d8   : > { %1005 = dma.done.wait (%p859_p8), %s756_s17, 64  }
 0x2d9   : > { %1007 = vsyncadd (%p859_p8), %s756_s17, 4294967232  ;;  %p15_p9 = scmp.ge.s32.totalorder %s1079_s24, 4   ;;  %s1417_s18 = smov %s1014_s19 }
 0x2da   : > { %s1418_s19 = smov %s1018_s20  ;;  %s1419_s20 = smov %s1090_s27 }
 0x2db   : > { %s1420_s21 = smov %s1079_s24  ;;  %17 = sbr.rel (!%p15_p9) target bundleno = 3 (0x3), region = 75 }
 0x2e0   :  { %762 = vsyncpa [#allocation3], 1 }
 0x2e1   :  { %764 = vsyncpa [#allocation3 + $0x1], 1 }

// kernel: tpu_custom_call.1
= control target key start
LH: loop header
LB: loop body
LE: loop exit
PB: predicated region body
PF: predicated region fallthrough
CT: control target
= control target key end

     0   :  { %vm29_vm0 = vcmask 261120   ;;  %vm63_vm1 = vcmask 326656   ;;  %vm87_vm2 = vcmask 31744   ;;  %s185_s1 = inlined_call_operand.vmem [shape: f32[32,40], index: 1, kind: input, shape index: {}]   ;;  %s186_s3 = inlined_call_operand.vmem [shape: f32[40,4], index: 3, kind: input, shape index: {}]   ;;  %s187_s2 = inlined_call_operand.vmem [shape: f32[1,40], index: 2, kind: input, shape index: {}]   ;;  %s188_s0 = inlined_call_operand.vmem [shape: f32[8,32], index: 0, kind: input, shape index: {}]   ;;  %s189_s4 = inlined_call_operand.vmem [shape: f32[1,4], index: 4, kind: input, shape index: {}]   ;;  %s190_s5 = inlined_call_operand.vmem [shape: f32[8,4], index: 5, kind: output, shape index: {}]  }
   0x1   :  { %v24_v0 = vld [vmem:[%s185_s1 + $0x18] sm:$0xff]  ;;  %v23_v1 = vld [vmem:[%s185_s1 + $0x10] sm:$0xff]  ;;  %v58_v2 = vld [vmem:[%s186_s3 + $0x20] sm:$0xff] }
   0x2   :  { %45 = vmatpush.msra.mxu0 %v24_v0  ;;  %v22_v3 = vld [vmem:[%s185_s1 + $0x8] sm:$0xff]  ;;  %78 = vmatpush.msra.mxu1 %v58_v2  ;;  %v57_v4 = vld [vmem:[%s186_s3 + $0x18] sm:$0xff]  ;;  %v21_v5 = vld [vmem:[%s185_s1] sm:$0xff] }
   0x3   :  { %v20_v6 = vld [vmem:[%s188_s0] sm:$0xff]  ;;  %v56_v7 = vld [vmem:[%s186_s3 + $0x10] sm:$0xff]  ;;  %v55_v8 = vld [vmem:[%s186_s3 + $0x8] sm:$0xff] }
   0x4   :  { %46 = vmatpush.msra.mxu0 %v23_v1  ;;  %79 = vmatpush.msra.mxu1 %v57_v4  ;;  %v54_v9 = vld [vmem:[%s186_s3] sm:$0xff] }
   0x5   :  { %v107_v10 = vld [vmem:[%s187_s2] ss:$0 sm:$0xff] }
   0x6   :  { %47 = vmatpush.msra.mxu0 %v22_v3  ;;  %80 = vmatpush.msra.mxu1 %v56_v7  ;;  %v108_v14 = vld [vmem:[%s189_s4] ss:$0 sm:$0xff] }
   0x8   :  { %48 = vmatpush.msra.mxu0 %v21_v5  ;;  %81 = vmatpush.msra.mxu1 %v55_v8 }
   0x9   :  { %105 = vmatmul.msk.f32.vlgmr.msra.gmra.mxu0 %vm29_vm0, %v20_v6 }
   0xa   :  { %82 = vmatpush.msra.mxu1 %v54_v9 }
  0x86   :  { %v50_v11 = vpop.f32.mrf.mxu0 }
  0x87   :  { %v51_v12 = vadd.f32 %v107_v10, %v50_v11 }
  0x89   :  { %v53_v13 = vmax.f32 %v51_v12, 0.0 }
  0x8b   :  { %106 = vmatmul.msk.f32.vlgmr.msra.gmra.mxu1 %vm63_vm1, %v53_v13 }
 0x108   :  { %v84_v15 = vpop.f32.mrf.mxu1 }
 0x109   :  { %v85_v16 = vadd.f32 %v108_v14, %v84_v15 }
 0x10b   :  { %v88_v17 = vsel %vm87_vm2, %v85_v16, -inf }
 0x10c   :  { %89 = vmax.xlane.f32.xlu0 %v88_v17 }
 0x17f   :  { %v90_v18 = vpop.xlane.xlu0 %89 }
 0x180   :  { %v91_v19 = vsub.f32 %v85_v16, %v90_v18 }
 0x182   :  { %v92_v20 = vmul.f32 1.442695, %v91_v19 }
 0x184   :  { %109 = vpow2.f32 %v92_v20 }
 0x18a   :  { %v110_v21 = vpop.eup %109 }
 0x18b   :  { %v94_v22 = vsel %vm87_vm2, %v110_v21, 0.0 }
 0x18c   :  { %95 = vadd.xlane.f32.xlu0 %v94_v22 }
 0x1ff   :  { %v96_v23 = vpop.xlane.xlu0 %95 }
 0x200   :  { %111 = vlog2.f32 %v96_v23 }
 0x206   :  { %v112_v24 = vpop.eup %111 }
 0x207   :  { %v98_v25 = vmul.f32 0.6931472, %v112_v24 }
 0x209   :  { %v99_v26 = vsub.f32 %v91_v19, %v98_v25 }
 0x20b   :  { %100 = vst.msk [vmem:[%s190_s5] sm:$0xff] %vm87_vm2, %v99_v26 }

</bundles_post_ra>
